<compile_context>
chip_gen: v7x
topology: tpu7x:2x2x1
jax: 0.10.0
libtpu: 0.0.40
codegen_flags: <defaults>
</compile_context>

<pallas_src>
import functools

import jax
import jax.numpy as jnp
from jax.experimental import pallas as pl
from jax.experimental.pallas import tpu as pltpu

IN_FEATURES = 6
H1 = 64
H2 = 128
OUT_FEATURES = 5


def _mlp_kernel(x_ref, w1_ref, b1_ref, w2_ref, b2_ref, w3_ref, b3_ref, o_ref,
                *, use_bf16: bool):
    # Whole MLP on one (tile_b, ...) batch tile, everything VMEM-resident.
    x = x_ref[...]                                   # (tile_b, 6)
    if use_bf16:
        x = x.astype(jnp.bfloat16)

    h1 = jnp.dot(x, w1_ref[...], preferred_element_type=jnp.float32) + b1_ref[...]
    h1 = jnp.maximum(h1, 0.0)                        # (tile_b, 64), f32
    if use_bf16:
        h1 = h1.astype(jnp.bfloat16)

    h2 = jnp.dot(h1, w2_ref[...], preferred_element_type=jnp.float32) + b2_ref[...]
    h2 = jnp.maximum(h2, 0.0)                        # (tile_b, 128), f32
    if use_bf16:
        h2 = h2.astype(jnp.bfloat16)

    out = jnp.dot(h2, w3_ref[...], preferred_element_type=jnp.float32) + b3_ref[...]
    o_ref[...] = out.astype(o_ref.dtype)             # (tile_b, 5)


def footprint_generator_forward(x, params, *, tile_b=2048, use_bf16=False):
    """x: (B, 6) float32. params: w1,b1,w2,b2,w3,b3 with weights as (in, out)."""
    w1, b1 = params["w1"], params["b1"]
    w2, b2 = params["w2"], params["b2"]
    w3, b3 = params["w3"], params["b3"]

    B = x.shape[0]

    # Rows per grid step: multiple of 8 sublanes, clamped for small batches.
    tile_b = max(8, min(int(tile_b), pl.cdiv(B, 8) * 8))
    tile_b = (tile_b // 8) * 8
    num_tiles = pl.cdiv(B, tile_b)   # ragged last block handled by Pallas

    if use_bf16:
        w1c = w1.astype(jnp.bfloat16)
        w2c = w2.astype(jnp.bfloat16)
        w3c = w3.astype(jnp.bfloat16)
    else:
        w1c, w2c, w3c = w1, w2, w3

    # Weights/biases: full-shape blocks, constant index_map -> VMEM-resident
    # across all grid steps.
    const = lambda a: pl.BlockSpec(a.shape, lambda i: (0, 0))

    out = pl.pallas_call(
        functools.partial(_mlp_kernel, use_bf16=use_bf16),
        out_shape=jax.ShapeDtypeStruct((B, OUT_FEATURES), x.dtype),
        grid=(num_tiles,),
        in_specs=[
            pl.BlockSpec((tile_b, IN_FEATURES), lambda i: (i, 0)),
            const(w1c), const(b1),
            const(w2c), const(b2),
            const(w3c), const(b3),
        ],
        out_specs=pl.BlockSpec((tile_b, OUT_FEATURES), lambda i: (i, 0)),
        compiler_params=pltpu.CompilerParams(
            dimension_semantics=("parallel",)),
    )(x, w1c, b1, w2c, b2, w3c, b3)

    return out


def init_params(key):
    """Deterministic init mirroring nn.Linear shapes (stored as (in, out))."""
    dims = [(IN_FEATURES, H1), (H1, H2), (H2, OUT_FEATURES)]
    params = {}
    keys = jax.random.split(key, len(dims) * 2)
    for i, (fin, fout) in enumerate(dims):
        bound = 1.0 / (fin ** 0.5)  # PyTorch default uniform(-1/sqrt(fan_in), ...)
        w = jax.random.uniform(keys[2 * i], (fin, fout), jnp.float32, -bound, bound)
        b = jax.random.uniform(keys[2 * i + 1], (1, fout), jnp.float32, -bound, bound)
        params[f"w{i + 1}"] = w
        params[f"b{i + 1}"] = b
    return params


def reference_forward(x, params):
    h = jnp.maximum(x @ params["w1"] + params["b1"], 0.0)
    h = jnp.maximum(h @ params["w2"] + params["b2"], 0.0)
    return h @ params["w3"] + params["b3"]


if __name__ == "__main__":
    key = jax.random.PRNGKey(0)
    k_param, k_x = jax.random.split(key)

    params = init_params(k_param)

    # Small demo shape (batch=8, single tile).
    x = jax.random.normal(k_x, (8, IN_FEATURES), dtype=jnp.float32)
    out = jax.block_until_ready(footprint_generator_forward(x, params))
    ref = reference_forward(x, params)
    assert out.shape == (8, OUT_FEATURES), out.shape
    assert jnp.allclose(out, ref, atol=1e-5, rtol=1e-5), "mismatch vs reference"

    # Ragged multi-tile batch (no wrapper-side padding; partial last block).
    x2 = jax.random.normal(k_x, (100, IN_FEATURES), dtype=jnp.float32)
    out2 = jax.block_until_ready(
        footprint_generator_forward(x2, params, tile_b=64))
    ref2 = reference_forward(x2, params)
    assert out2.shape == (100, OUT_FEATURES), out2.shape
    assert jnp.allclose(out2, ref2, atol=1e-5, rtol=1e-5), "mismatch (ragged)"

    # Optional bf16 MXU-operand path (f32 accumulation); looser tolerance.
    out_bf = jax.block_until_ready(
        footprint_generator_forward(x2, params, tile_b=64, use_bf16=True))
    assert out_bf.shape == (100, OUT_FEATURES), out_bf.shape
    assert jnp.allclose(out_bf, ref2, atol=5e-2, rtol=5e-2), "mismatch (bf16)"

    print("KERNEL_OK")
</pallas_src>

<mosaic_0001>
module attributes {stable_mosaic.version = 11 : i64} {
  func.func @_mlp_kernel(%arg0: i32, %arg1: memref<8x6xf32, #tpu.memory_space<vmem>>, %arg2: memref<6x64xf32, #tpu.memory_space<vmem>>, %arg3: memref<1x64xf32, #tpu.memory_space<vmem>>, %arg4: memref<64x128xf32, #tpu.memory_space<vmem>>, %arg5: memref<1x128xf32, #tpu.memory_space<vmem>>, %arg6: memref<128x5xf32, #tpu.memory_space<vmem>>, %arg7: memref<1x5xf32, #tpu.memory_space<vmem>>, %arg8: memref<8x5xf32, #tpu.memory_space<vmem>>) attributes {dimension_semantics = [#tpu.dimension_semantics<parallel>], iteration_bounds = array<i64: 1>, scalar_prefetch = 0 : i64, scratch_operands = 0 : i64, tpu.core_type = #tpu.core_type<tc>, window_params = [{transform_indices = @transform_0, window_bounds = array<i64: 8, 6>}, {pipeline_mode = #tpu.pipeline_mode<synchronous>, transform_indices = @transform_1, window_bounds = array<i64: 6, 64>}, {pipeline_mode = #tpu.pipeline_mode<synchronous>, transform_indices = @transform_2, window_bounds = array<i64: 1, 64>}, {pipeline_mode = #tpu.pipeline_mode<synchronous>, transform_indices = @transform_3, window_bounds = array<i64: 64, 128>}, {pipeline_mode = #tpu.pipeline_mode<synchronous>, transform_indices = @transform_4, window_bounds = array<i64: 1, 128>}, {pipeline_mode = #tpu.pipeline_mode<synchronous>, transform_indices = @transform_5, window_bounds = array<i64: 128, 5>}, {pipeline_mode = #tpu.pipeline_mode<synchronous>, transform_indices = @transform_6, window_bounds = array<i64: 1, 5>}, {transform_indices = @transform_7, window_bounds = array<i64: 8, 5>}]} {
    %c0 = arith.constant 0 : index
    %c0_0 = arith.constant 0 : index
    %0 = vector.load %arg1[%c0, %c0_0] : memref<8x6xf32, #tpu.memory_space<vmem>>, vector<8x6xf32>
    %c0_1 = arith.constant 0 : index
    %c0_2 = arith.constant 0 : index
    %1 = vector.load %arg2[%c0_1, %c0_2] : memref<6x64xf32, #tpu.memory_space<vmem>>, vector<6x64xf32>
    %cst = arith.constant dense<0.000000e+00> : vector<8x64xf32>
    %2 = tpu.matmul %0, %1, %cst {dimension_numbers = #tpu.dot_dimension_numbers<[1], [0], [0], [1], [0, 0, 1, 1], [], []>} : vector<8x6xf32>, vector<6x64xf32>, vector<8x64xf32> -> vector<8x64xf32>
    %c0_3 = arith.constant 0 : index
    %c0_4 = arith.constant 0 : index
    %3 = vector.load %arg3[%c0_3, %c0_4] : memref<1x64xf32, #tpu.memory_space<vmem>>, vector<1x64xf32>
    %4 = vector.broadcast %3 : vector<1x64xf32> to vector<8x64xf32>
    %5 = arith.addf %2, %4 : vector<8x64xf32>
    %cst_5 = arith.constant 0.000000e+00 : f32
    %6 = vector.broadcast %cst_5 : f32 to vector<8x64xf32>
    %7 = arith.maximumf %5, %6 : vector<8x64xf32>
    %c0_6 = arith.constant 0 : index
    %c0_7 = arith.constant 0 : index
    %8 = vector.load %arg4[%c0_6, %c0_7] : memref<64x128xf32, #tpu.memory_space<vmem>>, vector<64x128xf32>
    %cst_8 = arith.constant dense<0.000000e+00> : vector<8x128xf32>
    %9 = tpu.matmul %7, %8, %cst_8 {dimension_numbers = #tpu.dot_dimension_numbers<[1], [0], [0], [1], [0, 0, 1, 1], [], []>} : vector<8x64xf32>, vector<64x128xf32>, vector<8x128xf32> -> vector<8x128xf32>
    %c0_9 = arith.constant 0 : index
    %c0_10 = arith.constant 0 : index
    %10 = vector.load %arg5[%c0_9, %c0_10] : memref<1x128xf32, #tpu.memory_space<vmem>>, vector<1x128xf32>
    %11 = vector.broadcast %10 : vector<1x128xf32> to vector<8x128xf32>
    %12 = arith.addf %9, %11 : vector<8x128xf32>
    %cst_11 = arith.constant 0.000000e+00 : f32
    %13 = vector.broadcast %cst_11 : f32 to vector<8x128xf32>
    %14 = arith.maximumf %12, %13 : vector<8x128xf32>
    %c0_12 = arith.constant 0 : index
    %c0_13 = arith.constant 0 : index
    %15 = vector.load %arg6[%c0_12, %c0_13] : memref<128x5xf32, #tpu.memory_space<vmem>>, vector<128x5xf32>
    %cst_14 = arith.constant dense<0.000000e+00> : vector<8x5xf32>
    %16 = tpu.matmul %14, %15, %cst_14 {dimension_numbers = #tpu.dot_dimension_numbers<[1], [0], [0], [1], [0, 0, 1, 1], [], []>} : vector<8x128xf32>, vector<128x5xf32>, vector<8x5xf32> -> vector<8x5xf32>
    %c0_15 = arith.constant 0 : index
    %c0_16 = arith.constant 0 : index
    %17 = vector.load %arg7[%c0_15, %c0_16] : memref<1x5xf32, #tpu.memory_space<vmem>>, vector<1x5xf32>
    %18 = vector.broadcast %17 : vector<1x5xf32> to vector<8x5xf32>
    %19 = arith.addf %16, %18 : vector<8x5xf32>
    %c0_17 = arith.constant 0 : index
    %c0_18 = arith.constant 0 : index
    %20 = vector.load %arg8[%c0_17, %c0_18] : memref<8x5xf32, #tpu.memory_space<vmem>>, vector<8x5xf32>
    tpu.vector_store %arg8[%c0_17, %c0_18], %19 {strides = array<i32>} : memref<8x5xf32, #tpu.memory_space<vmem>>, vector<8x5xf32>,
    return
  }
  func.func @transform_0(%arg0: i32) -> (i32, i32) {
    %c0_i32 = arith.constant 0 : i32
    %c0_i32_0 = arith.constant 0 : i32
    return %arg0, %c0_i32 : i32, i32
  }
  func.func @transform_1(%arg0: i32) -> (i32, i32) {
    %c0_i32 = arith.constant 0 : i32
    %c0_i32_0 = arith.constant 0 : i32
    %c0_i32_1 = arith.constant 0 : i32
    return %c0_i32, %c0_i32_0 : i32, i32
  }
  func.func @transform_2(%arg0: i32) -> (i32, i32) {
    %c0_i32 = arith.constant 0 : i32
    %c0_i32_0 = arith.constant 0 : i32
    %c0_i32_1 = arith.constant 0 : i32
    return %c0_i32, %c0_i32_0 : i32, i32
  }
  func.func @transform_3(%arg0: i32) -> (i32, i32) {
    %c0_i32 = arith.constant 0 : i32
    %c0_i32_0 = arith.constant 0 : i32
    %c0_i32_1 = arith.constant 0 : i32
    return %c0_i32, %c0_i32_0 : i32, i32
  }
  func.func @transform_4(%arg0: i32) -> (i32, i32) {
    %c0_i32 = arith.constant 0 : i32
    %c0_i32_0 = arith.constant 0 : i32
    %c0_i32_1 = arith.constant 0 : i32
    return %c0_i32, %c0_i32_0 : i32, i32
  }
  func.func @transform_5(%arg0: i32) -> (i32, i32) {
    %c0_i32 = arith.constant 0 : i32
    %c0_i32_0 = arith.constant 0 : i32
    %c0_i32_1 = arith.constant 0 : i32
    return %c0_i32, %c0_i32_0 : i32, i32
  }
  func.func @transform_6(%arg0: i32) -> (i32, i32) {
    %c0_i32 = arith.constant 0 : i32
    %c0_i32_0 = arith.constant 0 : i32
    %c0_i32_1 = arith.constant 0 : i32
    return %c0_i32, %c0_i32_0 : i32, i32
  }
  func.func @transform_7(%arg0: i32) -> (i32, i32) {
    %c0_i32 = arith.constant 0 : i32
    %c0_i32_0 = arith.constant 0 : i32
    return %arg0, %c0_i32 : i32, i32
  }
}

</mosaic_0001>

<bundles_post_ra>
// kernel: tpu_custom_call.1
= control target key start
LH: loop header
LB: loop body
LE: loop exit
PB: predicated region body
PF: predicated region fallthrough
CT: control target
= control target key end

     0   :  { %vm40_vm0 = vcmask 1045504   ;;  %v471_v2 = vmov 0.0   ;;  %vm472_vm1 = vmmov 0   ;;  %vm36_vm2 = vcmask 48128   ;;  %s617_s0 = inlined_call_operand.vmem [shape: f32[8,6], index: 0, kind: input, shape index: {}]   ;;  %s618_s1 = inlined_call_operand.vmem [shape: f32[6,64], index: 1, kind: input, shape index: {}]   ;;  %s619_s2 = inlined_call_operand.vmem [shape: f32[1,64], index: 2, kind: input, shape index: {}]   ;;  %s620_s3 = inlined_call_operand.vmem [shape: f32[64,128], index: 3, kind: input, shape index: {}]   ;;  %s621_s4 = inlined_call_operand.vmem [shape: f32[1,128], index: 4, kind: input, shape index: {}]   ;;  %s622_s5 = inlined_call_operand.vmem [shape: f32[128,5], index: 5, kind: input, shape index: {}]   ;;  %s623_s6 = inlined_call_operand.vmem [shape: f32[1,5], index: 6, kind: input, shape index: {}]   ;;  %s624_s7 = inlined_call_operand.hbm [shape: f32[8,5], index: 7, kind: output, shape index: {}]  }
   0x1   :  { %v28_v0 = vld [vmem:[%s618_s1] sm:$0x3f]  ;;  %348 = vmatprep.subr.mxu1 %v471_v2  ;;  %350 = vmatprep.mubr.msk.f32.mxu1 %vm472_vm1, %v471_v2  ;;  %v116_v4 = vld [vmem:[%s620_s3 + $0x8] sm:$0xff]  ;;  %v117_v5 = vld [vmem:[%s620_s3 + $0x10] sm:$0xff]  ;;  %v473_v8 = vmov 0.0|0.0  }
   0x2   :  { %v27_v1 = vld [vmem:[%s617_s0] sm:$0xff]  ;;  %349 = vmatpush3.msk.msra.mxu1 %vm40_vm0, %v28_v0  ;;  %v118_v7 = vld [vmem:[%s620_s3 + $0x18] sm:$0xff]  ;;  %419 = vmatprep.subr.bf16.mxu0 %v473_v8 }
   0x3   :  { %v115_v3 = vld [vmem:[%s620_s3] sm:$0xff]  ;;  %351 = vmatmul.mubr.msk.f32.vlgmr.msra.gmra.mrb[0].mxu1 %vm36_vm2, %v27_v1  ;;  %407 = vmatprep.subr.bf16.mxu1 %v473_v8 }
   0x4   :  { %v408_v6 = vpack.c.bf16 %v116_v4, %v115_v3 }
   0x5   :  { %12 = vsyncpa [#allocation3], 0  ;;  %v411_v9 = vpack.c.bf16 %v118_v7, %v117_v5  ;;  %369 = vmatprep.mubr.msk.f32.mxu1 %vm472_vm1, %v471_v2  ;;  %v119_v10 = vld [vmem:[%s620_s3 + $0x20] sm:$0xff]  ;;  %v120_v11 = vld [vmem:[%s620_s3 + $0x28] sm:$0xff]  ;;  %404 = vmatprep.mubr.msk.f32.mxu0 %vm472_vm1, %v471_v2  ;;  %vm130_vm3 = vcmask 523264   ;;  %s474_s29 = smov [#allocation2]  }
   0x6   :  { %409 = vmatpush3.bf16.msra.mxu1 %v408_v6  ;;  %v414_v12 = vpack.c.bf16 %v120_v11, %v119_v10  ;;  %v121_v13 = vld [vmem:[%s620_s3 + $0x30] sm:$0xff]  ;;  %v122_v14 = vld [vmem:[%s620_s3 + $0x38] sm:$0xff]  ;;  %v205_v16 = vld [vmem:[%s622_s5] sm:$0xff]  ;;  %s306_s30 = sshll.u32 %s474_s29, 4  ;;  %vm298_vm4 = vcmask 39936   ;;  %s307_s30 = int_to_ptr.vmem [resolvable:$true] %s306_s30 }
   0x7   :  { %410 = vmatprep.subr.bf16.mxu1 %v473_v8  ;;  %v417_v15 = vpack.c.bf16 %v122_v14, %v121_v13  ;;  %v206_v17 = vld [vmem:[%s622_s5 + $0x8] sm:$0xff]  ;;  %v207_v18 = vld [vmem:[%s622_s5 + $0x10] sm:$0xff]  ;;  %v208_v20 = vld [vmem:[%s622_s5 + $0x18] sm:$0xff]  ;;  %p452_p1 = scmp.lt.s32.totalorder %s307_s30, %s307_s30 }
   0x8   :  { %v420_v19 = vpack.c.bf16 %v206_v17, %v205_v16  ;;  %v423_v21 = vpack.c.bf16 %v208_v20, %v207_v18  ;;  %v209_v22 = vld [vmem:[%s622_s5 + $0x20] sm:$0xff]  ;;  %v210_v23 = vld [vmem:[%s622_s5 + $0x28] sm:$0xff]  ;;  %v211_v25 = vld [vmem:[%s622_s5 + $0x30] sm:$0xff] }
   0x9   :  { %v426_v24 = vpack.c.bf16 %v210_v23, %v209_v22  ;;  %v212_v26 = vld [vmem:[%s622_s5 + $0x38] sm:$0xff]  ;;  %v213_v28 = vld [vmem:[%s622_s5 + $0x40] sm:$0xff]  ;;  %v214_v29 = vld [vmem:[%s622_s5 + $0x48] sm:$0xff] }
   0xa   :  { %412 = vmatpush3.bf16.msra.mxu1 %v411_v9  ;;  %421 = vmatpush3.bf16.msra.mxu0 %v420_v19  ;;  %v429_v27 = vpack.c.bf16 %v212_v26, %v211_v25  ;;  %v432_v30 = vpack.c.bf16 %v214_v29, %v213_v28  ;;  %v215_v31 = vld [vmem:[%s622_s5 + $0x50] sm:$0xff]  ;;  %v216_v32 = vld [vmem:[%s622_s5 + $0x58] sm:$0xff]  ;;  %v217_v34 = vld [vmem:[%s622_s5 + $0x60] sm:$0xff] }
   0xb   :  { %413 = vmatprep.subr.bf16.mxu1 %v473_v8  ;;  %422 = vmatprep.subr.bf16.mxu0 %v473_v8  ;;  %v435_v33 = vpack.c.bf16 %v216_v32, %v215_v31  ;;  %v218_v35 = vld [vmem:[%s622_s5 + $0x68] sm:$0xff]  ;;  %v314_v37 = vld [vmem:[%s619_s2] ss:$0 sm:$0xff]  ;;  %v219_v42 = vld [vmem:[%s622_s5 + $0x70] sm:$0xff] }
   0xc   :  { %v438_v36 = vpack.c.bf16 %v218_v35, %v217_v34  ;;  %v220_v43 = vld [vmem:[%s622_s5 + $0x78] sm:$0xff]  ;;  %v317_v45 = vld [vmem:[%s621_s4] ss:$0 sm:$0xff]  ;;  %s447_s5 = scalar_lea.vmem %s307_s30, 128 }
   0xd   :  { %v441_v44 = vpack.c.bf16 %v220_v43, %v219_v42  ;;  %v319_v50 = vld [vmem:[%s623_s6] ss:$0 sm:$0xff]  ;;  %p448_p0 = scmp.ne.s32.totalorder %s307_s30, %s447_s5  ;;  %p453_p2 = scmp.lt.s32.totalorder %s447_s5, %s447_s5 }
   0xe   :  { %415 = vmatpush3.bf16.msra.mxu1 %v414_v12  ;;  %424 = vmatpush3.bf16.msra.mxu0 %v423_v21 }
   0xf   :  { %416 = vmatprep.subr.bf16.mxu1 %v473_v8  ;;  %425 = vmatprep.subr.bf16.mxu0 %v473_v8  ;;  %p454_p3 = por %p453_p2, %p452_p1 }
  0x11   :  { %p455_p4 = pnand %p454_p3, %p448_p0 }
  0x12   :  { %418 = vmatpush3.bf16.msra.mxu1 %v417_v15  ;;  %427 = vmatpush3.bf16.msra.mxu0 %v426_v24 }
  0x13   :  { %428 = vmatprep.subr.bf16.mxu0 %v473_v8 }
  0x16   :  { %430 = vmatpush3.bf16.msra.mxu0 %v429_v27 }
  0x17   :  { %431 = vmatprep.subr.bf16.mxu0 %v473_v8 }
  0x1a   :  { %433 = vmatpush3.bf16.msra.mxu0 %v432_v30 }
  0x1b   :  { %434 = vmatprep.subr.bf16.mxu0 %v473_v8 }
  0x1e   :  { %436 = vmatpush3.bf16.msra.mxu0 %v435_v33 }
  0x1f   :  { %437 = vmatprep.subr.bf16.mxu0 %v473_v8 }
  0x22   :  { %439 = vmatpush3.bf16.msra.mxu0 %v438_v36 }
  0x23   :  { %440 = vmatprep.subr.bf16.mxu0 %v473_v8 }
  0x26   :  { %442 = vmatpush3.bf16.msra.mxu0 %v441_v44 }
  0xd6   :  { %v110_v38 = vpop.f32.mrb[0].mxu1 }
  0xd7   :  { %v111_v39 = vadd.f32 %v314_v37, %v110_v38  ;;  %v352_v40 = vpop.f32.mrb[1].mxu1 }
  0xd9   :  { %v114_v41 = vmax.f32 %v111_v39, 0.0 }
  0xdb   :  { %370 = vmatmul.mubr.msk.f32.vlgmr.msra.gmra.mrb[2].mxu1 %vm130_vm3, %v114_v41 }
 0x1ae   :  { %v200_v46 = vpop.f32.mrb[2].mxu1 }
 0x1af   :  { %v201_v47 = vadd.f32 %v317_v45, %v200_v46  ;;  %v371_v48 = vpop.f32.mrb[3].mxu1 }
 0x1b1   :  { %v204_v49 = vmax.f32 %v201_v47, 0.0 }
 0x1b3   :  { %405 = vmatmul.mubr.f32.vlgmr.msra.gmra.mrb[0].mxu0 %v204_v49 }
 0x286   :  { %v294_v51 = vpop.f32.mrb[0].mxu0 }
 0x287   :  { %v295_v52 = vadd.f32 %v319_v50, %v294_v51  ;;  %v406_v53 = vpop.f32.mrb[1].mxu0 }
 0x289   :  { %299 = vst.msk [vmem:[#allocation2] sm:$0xff] %vm298_vm4, %v295_v52 }
 0x28a   :  { %458 = shalt.err (!%p455_p4)
}
 0x28b   :  { %s459_s1 = scalar_lea.hbm %s624_s7, 128 }
 0x28c   :  { %p460_p5 = scmp.ne.s32.totalorder %s624_s7, %s459_s1  ;;  %p463_p6 = scmp.lt.u32.totalorder %s459_s1, %s624_s7 }
 0x28e   :  { %p465_p7 = pnand %p463_p6, %p460_p5 }
 0x290   :  { %468 = shalt.err (!%p465_p7)
}
 0x291   :  { %309 = dma.vmem_to_hbm [thread:$0]  %s307_s30, 128, %s624_s7, [#allocation3]  }
 0x292   :  { %469 = dma.done.wait [#allocation3], 128  }
 0x293   :  { %470 = vsyncadd [#allocation3], 4294967168 }
 0x294   :  { %313 = vsyncpa [#allocation3], 1 }

</bundles_post_ra>
